<compile_context>
chip_gen: v5e
topology: v5e:2x2
jax: 0.10.0
libtpu: 0.0.40
codegen_flags: <defaults>
</compile_context>

<pallas_src>
import math

import jax
import jax.numpy as jnp
from jax.experimental import pallas as pl
from jax.experimental.pallas import tpu as pltpu


# ------------------------------ Pallas kernel ------------------------------ #

def _stochastic_depth_kernel(scale_ref, x_ref, o_ref):
    """o = x * scale_row, scale_row in {0, 1/survival}, broadcast over lanes."""
    # scale_ref: (tile_n, 1) in x's dtype; x_ref / o_ref: (tile_n, L).
    o_ref[...] = x_ref[...] * scale_ref[...]


# ------------------------------ Python wrapper ------------------------------ #

_BLOCK_BUDGET_BYTES = 4 * 1024 * 1024   # ~4 MiB per block (x2 in/out, x2 dbl-buf)
_VMEM_LIMIT_BYTES = 32 * 1024 * 1024    # safe on v5e/v6e/v7x


def _pick_batch_tile(n_rows, row_bytes, budget=_BLOCK_BUDGET_BYTES):
    """Largest multiple-of-8 batch tile whose (tile_n, L) block fits the budget."""
    if n_rows * row_bytes <= budget:
        return n_rows                      # single block, grid of 1
    tile_n = max(8, ((budget // max(1, row_bytes)) // 8) * 8)
    return min(tile_n, n_rows)
    # TODO(synk): for pathologically large single rows (row_bytes >> budget) the
    # lane axis should additionally be tiled; not needed at these feature sizes.


def stochastic_depth(x, prob, seed, *, training=True, mode="row", batch_tile=None):
    """StochasticDepth forward matching the PyTorch module (inference + training)."""
    if prob == 0.0 or not training:
        return x                           # identity path — no kernel launched
    if prob >= 1.0:
        # survival == 0: every row is dropped (torchvision semantics; avoids 0/0).
        return jnp.zeros_like(x)

    survival = 1.0 - prob
    N = x.shape[0]
    L = math.prod(x.shape[1:]) if x.ndim > 1 else 1
    xf = x.reshape(N, L)
    itemsize = jnp.dtype(x.dtype).itemsize

    # One Bernoulli(survival) decision per row (or one total for mode='batch'),
    # folded with the 1/survival rescale into a tiny per-row scale vector.
    key = jax.random.PRNGKey(seed)
    if mode == "row":
        keep = jax.random.bernoulli(key, p=survival, shape=(N, 1))
    else:
        keep = jnp.broadcast_to(
            jax.random.bernoulli(key, p=survival, shape=(1, 1)), (N, 1))
    scale = jnp.where(keep,
                      jnp.asarray(1.0 / survival, dtype=x.dtype),
                      jnp.asarray(0.0, dtype=x.dtype))

    if batch_tile is None:
        tile_n = _pick_batch_tile(N, L * itemsize)
    else:
        tile_n = min(int(batch_tile), N)

    grid = (pl.cdiv(N, tile_n),)

    out = pl.pallas_call(
        _stochastic_depth_kernel,
        out_shape=jax.ShapeDtypeStruct((N, L), x.dtype),
        grid=grid,
        in_specs=[
            pl.BlockSpec((tile_n, 1), lambda i: (i, 0)),   # per-row scale
            pl.BlockSpec((tile_n, L), lambda i: (i, 0)),   # contiguous HBM block
        ],
        out_specs=pl.BlockSpec((tile_n, L), lambda i: (i, 0)),
        compiler_params=pltpu.CompilerParams(
            dimension_semantics=("parallel",),
            vmem_limit_bytes=_VMEM_LIMIT_BYTES,
        ),
        cost_estimate=pl.CostEstimate(
            flops=N * L,
            transcendentals=0,
            bytes_accessed=2 * N * L * itemsize + N * itemsize,
        ),
    )(scale, xf)
    return out.reshape(x.shape)


# --------------------------------- main ------------------------------------ #

if __name__ == "__main__":
    N, C, H, W = 2, 4, 16, 16
    prob = 0.25
    survival = 1.0 - prob
    seed = 1234

    x = jax.random.normal(jax.random.PRNGKey(0), (N, C, H, W), jnp.float32)

    # Identity paths: eval mode, or prob == 0.
    y_eval = stochastic_depth(x, prob, seed, training=False)
    assert jnp.array_equal(y_eval, x)
    y_p0 = stochastic_depth(x, 0.0, seed, training=True)
    assert jnp.array_equal(y_p0, x)

    # prob == 1.0: all rows dropped, no divide-by-zero.
    y_p1 = stochastic_depth(x, 1.0, seed, training=True)
    assert bool(jnp.all(y_p1 == 0.0))

    # Training path (row mode).
    y = jax.block_until_ready(stochastic_depth(x, prob, seed, training=True))

    # Deterministic w.r.t. seed.
    y_again = jax.block_until_ready(stochastic_depth(x, prob, seed, training=True))
    assert jnp.array_equal(y, y_again)

    # Semantics: every sample row is either dropped (all zeros) or scaled by
    # exactly 1/survival.
    yf = y.reshape(N, -1)
    xf = x.reshape(N, -1)
    for i in range(N):
        dropped = bool(jnp.all(yf[i] == 0.0))
        kept = bool(jnp.allclose(yf[i], xf[i] / survival, atol=1e-5, rtol=1e-5))
        assert dropped or kept, f"row {i} is neither dropped nor survival-scaled"

    # Batch mode: a single keep/drop decision shared by the whole tensor.
    y_batch = jax.block_until_ready(
        stochastic_depth(x, prob, seed, training=True, mode="batch"))
    all_zero = bool(jnp.all(y_batch == 0.0))
    all_scaled = bool(jnp.allclose(y_batch, x / survival, atol=1e-5, rtol=1e-5))
    assert all_zero or all_scaled

    # Batch-axis tiling (incl. a padded/masked last block) is result-invariant.
    x2 = jax.random.normal(jax.random.PRNGKey(1), (20, 8, 8, 8), jnp.float32)
    y2_full = jax.block_until_ready(stochastic_depth(x2, prob, seed, training=True))
    y2_tiled = jax.block_until_ready(
        stochastic_depth(x2, prob, seed, training=True, batch_tile=8))
    assert jnp.array_equal(y2_full, y2_tiled)

    print("KERNEL_OK")
</pallas_src>

<mosaic_0001>
module attributes {stable_mosaic.version = 11 : i64} {
  func.func @_stochastic_depth_kernel(%arg0: i32, %arg1: memref<2x1xf32, #tpu.memory_space<vmem>>, %arg2: memref<2x1024xf32, #tpu.memory_space<vmem>>, %arg3: memref<2x1024xf32, #tpu.memory_space<vmem>>) attributes {dimension_semantics = [#tpu.dimension_semantics<parallel>], iteration_bounds = array<i64: 1>, scalar_prefetch = 0 : i64, scratch_operands = 0 : i64, tpu.core_type = #tpu.core_type<tc>, window_params = [{transform_indices = @transform_0, window_bounds = array<i64: 2, 1>}, {transform_indices = @transform_1, window_bounds = array<i64: 2, 1024>}, {transform_indices = @transform_2, window_bounds = array<i64: 2, 1024>}]} {
    %c0 = arith.constant 0 : index
    %c0_0 = arith.constant 0 : index
    %0 = vector.load %arg2[%c0, %c0_0] : memref<2x1024xf32, #tpu.memory_space<vmem>>, vector<2x1024xf32>
    %c0_1 = arith.constant 0 : index
    %c0_2 = arith.constant 0 : index
    %1 = vector.load %arg1[%c0_1, %c0_2] : memref<2x1xf32, #tpu.memory_space<vmem>>, vector<2x1xf32>
    %2 = vector.broadcast %1 : vector<2x1xf32> to vector<2x1024xf32>
    %3 = arith.mulf %0, %2 : vector<2x1024xf32>
    %c0_3 = arith.constant 0 : index
    %c0_4 = arith.constant 0 : index
    %4 = vector.load %arg3[%c0_3, %c0_4] : memref<2x1024xf32, #tpu.memory_space<vmem>>, vector<2x1024xf32>
    tpu.vector_store %arg3[%c0_3, %c0_4], %3 {strides = array<i32>} : memref<2x1024xf32, #tpu.memory_space<vmem>>, vector<2x1024xf32>,
    return
  }
  func.func @transform_0(%arg0: i32) -> (i32, i32) {
    %c0_i32 = arith.constant 0 : i32
    %c0_i32_0 = arith.constant 0 : i32
    return %arg0, %c0_i32 : i32, i32
  }
  func.func @transform_1(%arg0: i32) -> (i32, i32) {
    %c0_i32 = arith.constant 0 : i32
    %c0_i32_0 = arith.constant 0 : i32
    return %arg0, %c0_i32 : i32, i32
  }
  func.func @transform_2(%arg0: i32) -> (i32, i32) {
    %c0_i32 = arith.constant 0 : i32
    %c0_i32_0 = arith.constant 0 : i32
    return %arg0, %c0_i32 : i32, i32
  }
}

</mosaic_0001>

<bundles_post_ra>
// kernel: tpu_custom_call.1
= control target key start
LH: loop header
LB: loop body
LE: loop exit
PB: predicated region body
PF: predicated region fallthrough
CT: control target
= control target key end

     0   :  { %7 = vsyncpa [#allocation3], 0  ;;  %s144_s0 = inlined_call_operand.vmem [shape: f32[2,1], index: 0, kind: input, shape index: {}]   ;;  %s145_s1 = inlined_call_operand.hbm [shape: f32[2,1024], index: 1, kind: input, shape index: {}]   ;;  %s146_s2 = inlined_call_operand.hbm [shape: f32[2,1024], index: 2, kind: output, shape index: {}]  }
   0x1   :  { %8 = vsyncpa [#allocation4], 0  ;;  %s16_s11 = sshll.u32 %s145_s1, 4  ;;  %s116_s12 = smov [#allocation2]   ;;  %s17_s11 = int_to_ptr.hbm [resolvable:$true] %s16_s11 }
   0x2   :  { %s18_s13 = sshll.u32 %s116_s12, 4  ;;  %s19_s13 = int_to_ptr.vmem [resolvable:$true] %s18_s13 }
   0x3   :  { %21 = dma.hbm_to_vmem [thread:$0]  %s17_s11, 256, %s19_s13, [#allocation3]  }
   0x4   :  { %112 = dma.done.wait [#allocation3], 256  }
   0x5   :  { %113 = vsyncadd [#allocation3], 4294967040  ;;  %v117_v0 = vmov 0   ;;  %v28_v1 = vld [vmem:[%s144_s0] sm:$0x3]  ;;  %v27_v7 = vld [vmem:[#allocation2 + $0x8] sm:$0xff] }
   0x6   :  { %63 = vset.pattern.permute.xlu0 %v117_v0  ;;  %v118_v2 = vmov 269488144   ;;  %v26_v6 = vld [vmem:[#allocation2] sm:$0xff]  ;;  %s119_s1 = smov [#allocation5]   ;;  %s49_s19 = sshll.u32 %s146_s2, 4  ;;  %s50_s19 = int_to_ptr.hbm [resolvable:$true] %s49_s19 }
   0x7   :  { %31 = vperm.xlu0 %63, %v28_v1   ;;  %v34_v3 = vunpack.c.l.s4 %v118_v2  ;;  %s47_s16 = sshll.u32 %s119_s1, 4  ;;  %s48_s16 = int_to_ptr.vmem [resolvable:$true] %s47_s16 }
   0x9   :  { %v35_v4 = vunpack.c.0.s8 %v34_v3 }
  0x79   :  { %v32_v5 = vpop.permute.xlu0 %31 }
  0x7a   :  { %v36_v8 = vperm.slane %v32_v5, %v35_v4 }
  0x7c   :  { %v38_v9 = vmul.f32 %v36_v8, %v26_v6  ;;  %v39_v10 = vmul.f32 %v36_v8, %v27_v7 }
  0x7e   :  { %40 = vst [vmem:[#allocation5] sm:$0xff] %v38_v9 }
  0x7f   :  { %41 = vst [vmem:[#allocation5 + $0x8] sm:$0xff] %v39_v10 }
  0x80   :  { %52 = dma.vmem_to_hbm [thread:$0]  %s48_s16, 256, %s50_s19, [#allocation4]  }
  0x81   :  { %114 = dma.done.wait [#allocation4], 256  }
  0x82   :  { %115 = vsyncadd [#allocation4], 4294967040 }
  0x83   :  { %57 = vsyncpa [#allocation3], 1 }
  0x84   :  { %58 = vsyncpa [#allocation4], 1 }

</bundles_post_ra>
